<compile_context>
chip_gen: v5e
topology: v5e:2x2
jax: 0.10.0
libtpu: 0.0.40
codegen_flags: <defaults>
</compile_context>

<pallas_src>
import jax
import jax.numpy as jnp
from jax.experimental import pallas as pl
from jax.experimental.pallas import tpu as pltpu


def _round_up(v, m):
    return (v + m - 1) // m * m


# ------------------------------- Pallas kernel --------------------------------

def _bottleneck_kernel(x_ref, w1_ref, b1_ref, w2_ref, c2_ref, w3_ref, ws_ref, c3_ref, out_ref):
    f32 = jnp.float32
    x = x_ref[...]                                                          # (rows, Cin)
    # conv1 (1x1, pad=1) + BN1 + ReLU, centre pixel (ring values folded into c2)
    a1 = jnp.maximum(jnp.dot(x, w1_ref[...], preferred_element_type=f32) + b1_ref[...], 0.0)
    # conv2 (3x3, pad=1) + BN2 + ReLU for all 9 inner pixels in one matmul (im2col fold)
    a2 = jnp.maximum(jnp.dot(a1, w2_ref[...], preferred_element_type=f32) + c2_ref[...], 0.0)
    # conv3 (1x1, pad=1) + BN3, scattered channel-major over the 9 inner pixels,
    # + shortcut (folded into the same column layout) + border columns + final ReLU.
    pre = (jnp.dot(a2, w3_ref[...], preferred_element_type=f32)
           + jnp.dot(x, ws_ref[...], preferred_element_type=f32)
           + c3_ref[...])
    out_ref[...] = jnp.maximum(pre, 0.0)                                    # (rows, P_out) lane-dense


# --------------------------------- wrapper -------------------------------------

def bottleneck_pallas(x_nchw, kp):
    """x_nchw: (N, Cin, 1, 1) float32.  kp: folded kernel params from fold_for_kernel."""
    N, Cin, H, W = x_nchw.shape
    if not (H == 1 and W == 1):
        # Same restriction as the PyTorch module: the residual add only broadcasts for 1x1.
        raise ValueError(f"Bottleneck only broadcasts for 1x1 spatial input, got {(H, W)}")
    C = kp["w1"].shape[1]
    P_out = kp["w3"].shape[1]                     # lane-padded output width (mult. of 128)

    # Row padding: at least one full sublane tile; tile rows at 128 for large batches.
    n_pad = _round_up(max(N, 8), 8)
    row_tile = min(n_pad, 128)
    n_pad = _round_up(n_pad, row_tile)

    x_rows = x_nchw.reshape(N, Cin).astype(jnp.float32)       # spatial 1x1 -> (N, Cin)
    if n_pad != N:
        x_rows = jnp.concatenate(
            [x_rows, jnp.zeros((n_pad - N, Cin), jnp.float32)], axis=0)

    out_flat = pl.pallas_call(
        _bottleneck_kernel,
        out_shape=jax.ShapeDtypeStruct((n_pad, P_out), jnp.float32),
        grid_spec=pltpu.PrefetchScalarGridSpec(
            num_scalar_prefetch=0,
            grid=(n_pad // row_tile,),                          # row-tiled, parallel axis
            in_specs=[
                pl.BlockSpec((row_tile, Cin), lambda i: (i, 0)),     # x rows
                pl.BlockSpec((Cin, C), lambda i: (0, 0)),            # W1 (BN1 folded)
                pl.BlockSpec((1, C), lambda i: (0, 0)),              # b1
                pl.BlockSpec((C, 9 * C), lambda i: (0, 0)),          # W2 (im2col taps, BN2 folded)
                pl.BlockSpec((1, 9 * C), lambda i: (0, 0)),          # c2 (bias + pad-ring terms)
                pl.BlockSpec((9 * C, P_out), lambda i: (0, 0)),      # W3 (per-pixel conv3 blocks)
                pl.BlockSpec((Cin, P_out), lambda i: (0, 0)),        # WS (shortcut, column-folded)
                pl.BlockSpec((1, P_out), lambda i: (0, 0)),          # c3 (b3 + bs per column)
            ],
            out_specs=pl.BlockSpec((row_tile, P_out), lambda i: (i, 0)),
        ),
        compiler_params=pltpu.CompilerParams(dimension_semantics=("parallel",)),
    )(x_rows, kp["w1"], kp["b1"], kp["w2"], kp["c2"], kp["w3"], kp["ws"], kp["c3"])

    # Channel-major slab -> NCHW with no transpose: pure reshape + slice placement.
    slab = out_flat[:N]                                    # drop row padding
    inner = slab[:, :9 * C].reshape(N, C, 3, 3)            # col = c*9 + pixel  -> (N,C,3,3)
    border = slab[:, 9 * C:10 * C]                         # (N, C) uniform border value
    out = jnp.broadcast_to(border[:, :, None, None], (N, C, 5, 5))
    out = out.at[:, :, 1:4, 1:4].set(inner)
    return out


# ----------------------------- parameter setup ---------------------------------

def init_params(key, in_channels, channels):
    ks = jax.random.split(key, 20)

    def conv_w(k, co, ci, kh, kw):
        bound = 1.0 / float(ci * kh * kw) ** 0.5
        return jax.random.uniform(k, (co, ci, kh, kw), jnp.float32, -bound, bound)

    def conv_b(k, co, fan_in):
        bound = 1.0 / float(fan_in) ** 0.5
        return jax.random.uniform(k, (co,), jnp.float32, -bound, bound)

    p = {
        "w1": conv_w(ks[0], channels, in_channels, 1, 1),
        "b1": conv_b(ks[1], channels, in_channels),
        "w2": conv_w(ks[2], channels, channels, 3, 3),
        "b2": conv_b(ks[3], channels, channels * 9),
        "w3": conv_w(ks[4], channels, channels, 1, 1),
        "b3": conv_b(ks[5], channels, channels),
        "ws": conv_w(ks[6], channels, in_channels, 1, 1),
        "bs": conv_b(ks[7], channels, in_channels),
    }
    for i, off in zip((1, 2, 3), (8, 12, 16)):
        p[f"bn{i}_gamma"] = jax.random.uniform(ks[off + 0], (channels,), jnp.float32, 0.5, 1.5)
        p[f"bn{i}_beta"] = jax.random.uniform(ks[off + 1], (channels,), jnp.float32, -0.5, 0.5)
        p[f"bn{i}_mean"] = jax.random.uniform(ks[off + 2], (channels,), jnp.float32, -0.5, 0.5)
        p[f"bn{i}_var"] = jax.random.uniform(ks[off + 3], (channels,), jnp.float32, 0.5, 1.5)
    return p


def fold_for_kernel(p, eps=1e-5):
    """Fold eval-mode BatchNorm + conv padding structure into dense matmul weights."""
    def fold(w, b, g, beta, mean, var):
        s = g / jnp.sqrt(var + eps)
        return w * s[:, None, None, None], (b - mean) * s + beta

    w1f, b1f = fold(p["w1"], p["b1"], p["bn1_gamma"], p["bn1_beta"], p["bn1_mean"], p["bn1_var"])
    w2f, b2f = fold(p["w2"], p["b2"], p["bn2_gamma"], p["bn2_beta"], p["bn2_mean"], p["bn2_var"])
    w3f, b3f = fold(p["w3"], p["b3"], p["bn3_gamma"], p["bn3_beta"], p["bn3_mean"], p["bn3_var"])
    C = p["w1"].shape[0]
    Cin = p["w1"].shape[1]

    # conv1+BN1+ReLU value at the 8 pad-ring positions of its 3x3 output (conv over zeros):
    ring1 = jnp.maximum(b1f, 0.0)                                  # (C,)

    # --- conv2 (3x3, pad=1) over the 3x3 conv1 output, im2col-folded (pixel-major) -----
    # output pixel k=(i,j): a2[k] = relu(a1_centre @ W2_blk[k] + c2_blk[k]); only the
    # centre pixel of conv1's output is batch-dependent, all ring/zero-pad terms are const.
    w2_blocks, c2_blocks = [], []
    for i in range(3):
        for j in range(3):
            w2_blocks.append(jnp.transpose(w2f[:, :, 2 - i, 2 - j]))   # tap hitting the centre
            c = b2f
            for kh in range(3):
                for kw in range(3):
                    r, cc = i + kh, j + kw
                    if 1 <= r <= 3 and 1 <= cc <= 3 and (r, cc) != (2, 2):
                        c = c + ring1 @ jnp.transpose(w2f[:, :, kh, kw])
            c2_blocks.append(c)
    W2 = jnp.concatenate(w2_blocks, axis=1)                        # (C, 9*C)
    C2 = jnp.concatenate(c2_blocks, axis=0)[None, :]               # (1, 9*C)

    # --- stage 3: channel-major output columns, lane-padded to a multiple of 128 --------
    #   columns [0 .. 9C)   : inner 3x3 pixels, channel-major  (col = c*9 + pixel)
    #   columns [9C .. 10C) : per-channel border value (shared by all 16 border pixels)
    #   columns [10C .. P)  : zero lane padding (sliced off in the wrapper)
    P_used = 10 * C
    P_out = _round_up(P_used, 128)

    w3t = jnp.transpose(w3f[:, :, 0, 0])                           # (C, C): [d, c]
    W3 = jnp.zeros((9 * C, P_out), jnp.float32)
    for k in range(9):                                             # inner pixel index
        # a2 rows k*C+d  ->  output columns c*9 + k   (strided column set, stride 9)
        W3 = W3.at[k * C:(k + 1) * C, k:9 * C:9].set(w3t)

    wst = jnp.transpose(p["ws"][:, :, 0, 0])                       # (Cin, C)
    bias_c = b3f + p["bs"]                                         # (C,)

    WS = jnp.zeros((Cin, P_out), jnp.float32)
    WS = WS.at[:, :9 * C].set(jnp.repeat(wst, 9, axis=1))          # one copy per inner pixel
    WS = WS.at[:, 9 * C:10 * C].set(wst)                           # one copy for the border

    C3 = jnp.zeros((1, P_out), jnp.float32)
    C3 = C3.at[0, :9 * C].set(jnp.repeat(bias_c, 9))
    C3 = C3.at[0, 9 * C:10 * C].set(bias_c)

    return {
        "w1": jnp.transpose(w1f[:, :, 0, 0]),                      # (Cin, C)
        "b1": b1f[None, :],                                        # (1, C)
        "w2": W2, "c2": C2, "w3": W3, "ws": WS, "c3": C3,
    }


# ----------------------------- pure-JAX reference ------------------------------

def bottleneck_reference(x, p, eps=1e-5):
    def conv(x, w, b, pad):
        y = jax.lax.conv_general_dilated(
            x, w, window_strides=(1, 1), padding=((pad, pad), (pad, pad)),
            dimension_numbers=("NCHW", "OIHW", "NCHW"))
        return y + b[None, :, None, None]

    def bn(y, g, beta, mean, var):
        return (y - mean[None, :, None, None]) / jnp.sqrt(var[None, :, None, None] + eps) \
            * g[None, :, None, None] + beta[None, :, None, None]

    h = jax.nn.relu(bn(conv(x, p["w1"], p["b1"], 1),
                       p["bn1_gamma"], p["bn1_beta"], p["bn1_mean"], p["bn1_var"]))
    h = jax.nn.relu(bn(conv(h, p["w2"], p["b2"], 1),
                       p["bn2_gamma"], p["bn2_beta"], p["bn2_mean"], p["bn2_var"]))
    h = bn(conv(h, p["w3"], p["b3"], 1),
           p["bn3_gamma"], p["bn3_beta"], p["bn3_mean"], p["bn3_var"])
    sc = conv(x, p["ws"], p["bs"], 0)
    return jax.nn.relu(h + sc)


if __name__ == "__main__":
    N, IN_CH, CH = 2, 8, 16          # batch=2, in_channels=8, channels=16, spatial 1x1
    key = jax.random.PRNGKey(0)
    kx, kparams = jax.random.split(key)
    x = jax.random.normal(kx, (N, IN_CH, 1, 1), jnp.float32)

    raw = init_params(kparams, IN_CH, CH)
    kp = fold_for_kernel(raw)

    out = jax.block_until_ready(bottleneck_pallas(x, kp))

    ref = bottleneck_reference(x, raw)
    assert out.shape == ref.shape == (N, CH, 5, 5), (out.shape, ref.shape)
    if not bool(jnp.allclose(out, ref, atol=1e-3, rtol=1e-3)):
        raise AssertionError(
            f"kernel/reference mismatch, max abs err = {float(jnp.max(jnp.abs(out - ref)))}")
    print("KERNEL_OK")
</pallas_src>

<mosaic_0001>
module attributes {stable_mosaic.version = 11 : i64} {
  func.func @_bottleneck_kernel(%arg0: i32, %arg1: memref<8x8xf32, #tpu.memory_space<vmem>>, %arg2: memref<8x16xf32, #tpu.memory_space<vmem>>, %arg3: memref<1x16xf32, #tpu.memory_space<vmem>>, %arg4: memref<16x144xf32, #tpu.memory_space<vmem>>, %arg5: memref<1x144xf32, #tpu.memory_space<vmem>>, %arg6: memref<144x256xf32, #tpu.memory_space<vmem>>, %arg7: memref<8x256xf32, #tpu.memory_space<vmem>>, %arg8: memref<1x256xf32, #tpu.memory_space<vmem>>, %arg9: memref<8x256xf32, #tpu.memory_space<vmem>>) attributes {dimension_semantics = [#tpu.dimension_semantics<parallel>], iteration_bounds = array<i64: 1>, scalar_prefetch = 0 : i64, scratch_operands = 0 : i64, tpu.core_type = #tpu.core_type<tc>, window_params = [{transform_indices = @transform_0, window_bounds = array<i64: 8, 8>}, {pipeline_mode = #tpu.pipeline_mode<synchronous>, transform_indices = @transform_1, window_bounds = array<i64: 8, 16>}, {pipeline_mode = #tpu.pipeline_mode<synchronous>, transform_indices = @transform_2, window_bounds = array<i64: 1, 16>}, {pipeline_mode = #tpu.pipeline_mode<synchronous>, transform_indices = @transform_3, window_bounds = array<i64: 16, 144>}, {pipeline_mode = #tpu.pipeline_mode<synchronous>, transform_indices = @transform_4, window_bounds = array<i64: 1, 144>}, {pipeline_mode = #tpu.pipeline_mode<synchronous>, transform_indices = @transform_5, window_bounds = array<i64: 144, 256>}, {pipeline_mode = #tpu.pipeline_mode<synchronous>, transform_indices = @transform_6, window_bounds = array<i64: 8, 256>}, {pipeline_mode = #tpu.pipeline_mode<synchronous>, transform_indices = @transform_7, window_bounds = array<i64: 1, 256>}, {transform_indices = @transform_8, window_bounds = array<i64: 8, 256>}]} {
    %c0 = arith.constant 0 : index
    %c0_0 = arith.constant 0 : index
    %0 = vector.load %arg1[%c0, %c0_0] : memref<8x8xf32, #tpu.memory_space<vmem>>, vector<8x8xf32>
    %c0_1 = arith.constant 0 : index
    %c0_2 = arith.constant 0 : index
    %1 = vector.load %arg2[%c0_1, %c0_2] : memref<8x16xf32, #tpu.memory_space<vmem>>, vector<8x16xf32>
    %cst = arith.constant dense<0.000000e+00> : vector<8x16xf32>
    %2 = tpu.matmul %0, %1, %cst {dimension_numbers = #tpu.dot_dimension_numbers<[1], [0], [0], [1], [0, 0, 1, 1], [], []>} : vector<8x8xf32>, vector<8x16xf32>, vector<8x16xf32> -> vector<8x16xf32>
    %c0_3 = arith.constant 0 : index
    %c0_4 = arith.constant 0 : index
    %3 = vector.load %arg3[%c0_3, %c0_4] : memref<1x16xf32, #tpu.memory_space<vmem>>, vector<1x16xf32>
    %4 = vector.broadcast %3 : vector<1x16xf32> to vector<8x16xf32>
    %5 = arith.addf %2, %4 : vector<8x16xf32>
    %cst_5 = arith.constant 0.000000e+00 : f32
    %6 = vector.broadcast %cst_5 : f32 to vector<8x16xf32>
    %7 = arith.maximumf %5, %6 : vector<8x16xf32>
    %c0_6 = arith.constant 0 : index
    %c0_7 = arith.constant 0 : index
    %8 = vector.load %arg4[%c0_6, %c0_7] : memref<16x144xf32, #tpu.memory_space<vmem>>, vector<16x144xf32>
    %cst_8 = arith.constant dense<0.000000e+00> : vector<8x144xf32>
    %9 = tpu.matmul %7, %8, %cst_8 {dimension_numbers = #tpu.dot_dimension_numbers<[1], [0], [0], [1], [0, 0, 1, 1], [], []>} : vector<8x16xf32>, vector<16x144xf32>, vector<8x144xf32> -> vector<8x144xf32>
    %c0_9 = arith.constant 0 : index
    %c0_10 = arith.constant 0 : index
    %10 = vector.load %arg5[%c0_9, %c0_10] : memref<1x144xf32, #tpu.memory_space<vmem>>, vector<1x144xf32>
    %11 = vector.broadcast %10 : vector<1x144xf32> to vector<8x144xf32>
    %12 = arith.addf %9, %11 : vector<8x144xf32>
    %cst_11 = arith.constant 0.000000e+00 : f32
    %13 = vector.broadcast %cst_11 : f32 to vector<8x144xf32>
    %14 = arith.maximumf %12, %13 : vector<8x144xf32>
    %c0_12 = arith.constant 0 : index
    %c0_13 = arith.constant 0 : index
    %15 = vector.load %arg6[%c0_12, %c0_13] : memref<144x256xf32, #tpu.memory_space<vmem>>, vector<144x256xf32>
    %cst_14 = arith.constant dense<0.000000e+00> : vector<8x256xf32>
    %16 = tpu.matmul %14, %15, %cst_14 {dimension_numbers = #tpu.dot_dimension_numbers<[1], [0], [0], [1], [0, 0, 1, 1], [], []>} : vector<8x144xf32>, vector<144x256xf32>, vector<8x256xf32> -> vector<8x256xf32>
    %c0_15 = arith.constant 0 : index
    %c0_16 = arith.constant 0 : index
    %17 = vector.load %arg7[%c0_15, %c0_16] : memref<8x256xf32, #tpu.memory_space<vmem>>, vector<8x256xf32>
    %cst_17 = arith.constant dense<0.000000e+00> : vector<8x256xf32>
    %18 = tpu.matmul %0, %17, %cst_17 {dimension_numbers = #tpu.dot_dimension_numbers<[1], [0], [0], [1], [0, 0, 1, 1], [], []>} : vector<8x8xf32>, vector<8x256xf32>, vector<8x256xf32> -> vector<8x256xf32>
    %19 = arith.addf %16, %18 : vector<8x256xf32>
    %c0_18 = arith.constant 0 : index
    %c0_19 = arith.constant 0 : index
    %20 = vector.load %arg8[%c0_18, %c0_19] : memref<1x256xf32, #tpu.memory_space<vmem>>, vector<1x256xf32>
    %21 = vector.broadcast %20 : vector<1x256xf32> to vector<8x256xf32>
    %22 = arith.addf %19, %21 : vector<8x256xf32>
    %cst_20 = arith.constant 0.000000e+00 : f32
    %23 = vector.broadcast %cst_20 : f32 to vector<8x256xf32>
    %24 = arith.maximumf %22, %23 : vector<8x256xf32>
    %c0_21 = arith.constant 0 : index
    %c0_22 = arith.constant 0 : index
    %25 = vector.load %arg9[%c0_21, %c0_22] : memref<8x256xf32, #tpu.memory_space<vmem>>, vector<8x256xf32>
    tpu.vector_store %arg9[%c0_21, %c0_22], %24 {strides = array<i32>} : memref<8x256xf32, #tpu.memory_space<vmem>>, vector<8x256xf32>,
    return
  }
  func.func @transform_0(%arg0: i32) -> (i32, i32) {
    %c0_i32 = arith.constant 0 : i32
    %c0_i32_0 = arith.constant 0 : i32
    return %arg0, %c0_i32 : i32, i32
  }
  func.func @transform_1(%arg0: i32) -> (i32, i32) {
    %c0_i32 = arith.constant 0 : i32
    %c0_i32_0 = arith.constant 0 : i32
    %c0_i32_1 = arith.constant 0 : i32
    return %c0_i32, %c0_i32_0 : i32, i32
  }
  func.func @transform_2(%arg0: i32) -> (i32, i32) {
    %c0_i32 = arith.constant 0 : i32
    %c0_i32_0 = arith.constant 0 : i32
    %c0_i32_1 = arith.constant 0 : i32
    return %c0_i32, %c0_i32_0 : i32, i32
  }
  func.func @transform_3(%arg0: i32) -> (i32, i32) {
    %c0_i32 = arith.constant 0 : i32
    %c0_i32_0 = arith.constant 0 : i32
    %c0_i32_1 = arith.constant 0 : i32
    return %c0_i32, %c0_i32_0 : i32, i32
  }
  func.func @transform_4(%arg0: i32) -> (i32, i32) {
    %c0_i32 = arith.constant 0 : i32
    %c0_i32_0 = arith.constant 0 : i32
    %c0_i32_1 = arith.constant 0 : i32
    return %c0_i32, %c0_i32_0 : i32, i32
  }
  func.func @transform_5(%arg0: i32) -> (i32, i32) {
    %c0_i32 = arith.constant 0 : i32
    %c0_i32_0 = arith.constant 0 : i32
    %c0_i32_1 = arith.constant 0 : i32
    return %c0_i32, %c0_i32_0 : i32, i32
  }
  func.func @transform_6(%arg0: i32) -> (i32, i32) {
    %c0_i32 = arith.constant 0 : i32
    %c0_i32_0 = arith.constant 0 : i32
    %c0_i32_1 = arith.constant 0 : i32
    return %c0_i32, %c0_i32_0 : i32, i32
  }
  func.func @transform_7(%arg0: i32) -> (i32, i32) {
    %c0_i32 = arith.constant 0 : i32
    %c0_i32_0 = arith.constant 0 : i32
    %c0_i32_1 = arith.constant 0 : i32
    return %c0_i32, %c0_i32_0 : i32, i32
  }
  func.func @transform_8(%arg0: i32) -> (i32, i32) {
    %c0_i32 = arith.constant 0 : i32
    %c0_i32_0 = arith.constant 0 : i32
    return %arg0, %c0_i32 : i32, i32
  }
}

</mosaic_0001>

<bundles_post_ra>
// kernel: tpu_custom_call.1
= control target key start
LH: loop header
LB: loop body
LE: loop exit
PB: predicated region body
PF: predicated region fallthrough
CT: control target
= control target key end

     0   :  { %13 = vsyncpa [#allocation3], 0  ;;  %s679_s0 = inlined_call_operand.hbm [shape: f32[8,8], index: 0, kind: input, shape index: {}]   ;;  %s680_s1 = inlined_call_operand.hbm [shape: f32[8,16], index: 1, kind: input, shape index: {}]   ;;  %s681_s2 = inlined_call_operand.hbm [shape: f32[1,16], index: 2, kind: input, shape index: {}]   ;;  %s682_s3 = inlined_call_operand.hbm [shape: f32[16,144], index: 3, kind: input, shape index: {}]   ;;  %s683_s4 = inlined_call_operand.vmem [shape: f32[1,144], index: 4, kind: input, shape index: {}]   ;;  %s684_s5 = inlined_call_operand.hbm [shape: f32[144,256], index: 5, kind: input, shape index: {}]   ;;  %s685_s6 = inlined_call_operand.hbm [shape: f32[8,256], index: 6, kind: input, shape index: {}]   ;;  %s686_s7 = inlined_call_operand.vmem [shape: f32[1,256], index: 7, kind: input, shape index: {}]   ;;  %s687_s8 = inlined_call_operand.hbm [shape: f32[8,256], index: 8, kind: output, shape index: {}]  }
   0x1   :  { %14 = vsyncpa [#allocation6], 0 }
   0x2   :  { %15 = vsyncpa [#allocation9], 0 }
   0x3   :  { %16 = vsyncpa [#allocation12], 0  ;;  %s34_s29 = sshll.u32 %s680_s1, 4  ;;  %s35_s29 = int_to_ptr.hbm [resolvable:$true] %s34_s29 }
   0x4   :  { %17 = vsyncpa [#allocation4], 0  ;;  %s591_s30 = smov [#allocation5]   ;;  %s55_s12 = sshll.u32 %s682_s3, 4  ;;  %s56_s12 = int_to_ptr.hbm [resolvable:$true] %s55_s12 }
   0x5   :  { %s36_s9 = sshll.u32 %s591_s30, 4  ;;  %s592_s13 = smov [#allocation8]   ;;  %s37_s9 = int_to_ptr.vmem [resolvable:$true] %s36_s9 }
   0x6   :  { %39 = dma.hbm_to_vmem [thread:$0]  %s35_s29, 128, %s37_s9, [#allocation6]  }
   0x7   :  { %s57_s14 = sshll.u32 %s592_s13, 4  ;;  %s593_s15 = smov 256   ;;  %s58_s14 = int_to_ptr.vmem [resolvable:$true] %s57_s14 }
   0x8   :  { %s594_s16 = smov 16   ;;  %s23_s1 = sshll.u32 %s679_s0, 4  ;;  %s24_s1 = int_to_ptr.hbm [resolvable:$true] %s23_s1 }
   0x9   :  { %63 = dma.hbm_to_vmem [thread:$0]  %s56_s12, 512, %s58_s14, [#allocation9], %s593_s15, %s593_s15, %s594_s16  }
   0xa   :  { %s595_s19 = smov [#allocation2]   ;;  %s45_s3 = sshll.u32 %s681_s2, 4  ;;  %s46_s3 = int_to_ptr.hbm [resolvable:$true] %s45_s3 }
   0xb   :  { %s25_s20 = sshll.u32 %s595_s19, 4  ;;  %s596_s23 = smov [#allocation7]   ;;  %s26_s20 = int_to_ptr.vmem [resolvable:$true] %s25_s20 }
   0xc   :  { %28 = dma.hbm_to_vmem [thread:$0]  %s24_s1, 128, %s26_s20, [#allocation3]  }
   0xd   :  { %s47_s24 = sshll.u32 %s596_s23, 4  ;;  %s70_s27 = sshll.u32 %s684_s5, 4  ;;  %s48_s24 = int_to_ptr.vmem [resolvable:$true] %s47_s24  ;;  %s71_s27 = int_to_ptr.hbm [resolvable:$true] %s70_s27 }
   0xe   :  { %50 = dma.hbm_to_vmem [thread:$0]  %s46_s3, 16, %s48_s24, [#allocation6]  }
   0xf   :  { %s84_s29 = sshll.u32 %s685_s6, 4  ;;  %s597_s30 = smov [#allocation10]   ;;  %s85_s29 = int_to_ptr.hbm [resolvable:$true] %s84_s29 }
  0x10   :  { %s72_s9 = sshll.u32 %s597_s30, 4  ;;  %s598_s2 = smov [#allocation11]   ;;  %s73_s9 = int_to_ptr.vmem [resolvable:$true] %s72_s9 }
  0x11   :  { %78 = dma.hbm_to_vmem [thread:$0]  %s71_s27, 4608, %s73_s9, [#allocation9], %s593_s15, %s593_s15, %s594_s16  }
  0x12   :  { %s86_s10 = sshll.u32 %s598_s2, 4  ;;  %s87_s10 = int_to_ptr.vmem [resolvable:$true] %s86_s10 }
  0x13   :  { %89 = dma.hbm_to_vmem [thread:$0]  %s85_s29, 256, %s87_s10, [#allocation12]  }
  0x14   :  { %581 = dma.done.wait [#allocation3], 128  }
  0x15   :  { %582 = vsyncadd [#allocation3], 4294967168 }
  0x16   :  { %583 = dma.done.wait [#allocation6], 144  }
  0x17   :  { %584 = vsyncadd [#allocation6], 4294967152 }
  0x18   :  { %585 = dma.done.wait [#allocation9], 5120  }
  0x19   :  { %586 = vsyncadd [#allocation9], 4294962176 }
  0x1a   :  { %587 = dma.done.wait [#allocation12], 256  }
  0x1b   :  { %588 = vsyncadd [#allocation12], 4294967040  ;;  %vm122_vm0 = vcmask 64512   ;;  %v117_v0 = vld [vmem:[#allocation5] sm:$0xff]  ;;  %v116_v1 = vld [vmem:[#allocation2] sm:$0xff]  ;;  %vm157_vm1 = vcmask 130048  }
  0x1c   :  { %141 = vmatpush.msra.mxu0 %v117_v0  ;;  %v149_v2 = vld [vmem:[#allocation8 + $0x10] sm:$0xff]  ;;  %v147_v3 = vld [vmem:[#allocation8] sm:$0xff]  ;;  %v150_v4 = vld [vmem:[#allocation8 + $0x18] sm:$0xff]  ;;  %s383_s16 = sshll.u32 %s687_s8, 4  ;;  %s384_s16 = int_to_ptr.hbm [resolvable:$true] %s383_s16 }
  0x1d   :  { %396 = vmatmul.msk.f32.vlgmr.msra.gmra.mxu0 %vm122_vm0, %v116_v1  ;;  %175 = vmatpush.msra.mxu1 %v149_v2  ;;  %v148_v5 = vld [vmem:[#allocation8 + $0x8] sm:$0xff]  ;;  %v233_v6 = vld [vmem:[#allocation10 + $0xf0] sm:$0xff]  ;;  %v234_v7 = vld [vmem:[#allocation10 + $0xf8] sm:$0xff] }
  0x1e   :  { %v231_v8 = vld [vmem:[#allocation10 + $0xe0] sm:$0xff]  ;;  %284 = vmatpush.msra.mxu3 %v233_v6  ;;  %324 = vmatpush.msra.mxu2 %v234_v7  ;;  %v232_v9 = vld [vmem:[#allocation10 + $0xe8] sm:$0xff]  ;;  %v229_v10 = vld [vmem:[#allocation10 + $0xd0] sm:$0xff] }
  0x1f   :  { %176 = vmatpush.msra.mxu1 %v147_v3  ;;  %v230_v11 = vld [vmem:[#allocation10 + $0xd8] sm:$0xff]  ;;  %v227_v12 = vld [vmem:[#allocation10 + $0xc0] sm:$0xff]  ;;  %v228_v13 = vld [vmem:[#allocation10 + $0xc8] sm:$0xff] }
  0x20   :  { %285 = vmatpush.msra.mxu3 %v231_v8  ;;  %325 = vmatpush.msra.mxu2 %v232_v9  ;;  %v239_v14 = vld [vmem:[#allocation11] sm:$0xff]  ;;  %v225_v15 = vld [vmem:[#allocation10 + $0xb0] sm:$0xff]  ;;  %v226_v16 = vld [vmem:[#allocation10 + $0xb8] sm:$0xff] }
  0x21   :  { %195 = vmatpush.msrb.mxu1 %v150_v4  ;;  %256 = vmatpush.msrb.mxu0 %v239_v14  ;;  %v223_v17 = vld [vmem:[#allocation10 + $0xa0] sm:$0xff]  ;;  %v224_v18 = vld [vmem:[#allocation10 + $0xa8] sm:$0xff]  ;;  %v221_v20 = vld [vmem:[#allocation10 + $0x90] sm:$0xff] }
  0x22   :  { %286 = vmatpush.msra.mxu3 %v229_v10  ;;  %326 = vmatpush.msra.mxu2 %v230_v11  ;;  %v240_v19 = vld [vmem:[#allocation11 + $0x8] sm:$0xff]  ;;  %v222_v21 = vld [vmem:[#allocation10 + $0x98] sm:$0xff]  ;;  %v219_v22 = vld [vmem:[#allocation10 + $0x80] sm:$0xff] }
  0x23   :  { %196 = vmatpush.msrb.mxu1 %v148_v5  ;;  %276 = vmatpush.msra.mxu0 %v240_v19  ;;  %v220_v23 = vld [vmem:[#allocation10 + $0x88] sm:$0xff]  ;;  %v217_v24 = vld [vmem:[#allocation10 + $0x70] sm:$0xff]  ;;  %v218_v25 = vld [vmem:[#allocation10 + $0x78] sm:$0xff] }
  0x24   :  { %287 = vmatpush.msra.mxu3 %v227_v12  ;;  %327 = vmatpush.msra.mxu2 %v228_v13  ;;  %v412_v26 = vld [vmem:[#allocation7] ss:$0 sm:$0xff]  ;;  %v215_v27 = vld [vmem:[#allocation10 + $0x60] sm:$0xff]  ;;  %v216_v28 = vld [vmem:[#allocation10 + $0x68] sm:$0xff] }
  0x25   :  { %399 = vmatmul.msk.f32.vlgmr.msrb.gmra.mxu0 %vm122_vm0, %v116_v1  ;;  %v213_v29 = vld [vmem:[#allocation10 + $0x50] sm:$0xff]  ;;  %v214_v30 = vld [vmem:[#allocation10 + $0x58] sm:$0xff]  ;;  %v211_v33 = vld [vmem:[#allocation10 + $0x40] sm:$0xff] }
  0x26   :  { %288 = vmatpush.msra.mxu3 %v225_v15  ;;  %328 = vmatpush.msra.mxu2 %v226_v16  ;;  %v212_v34 = vld [vmem:[#allocation10 + $0x48] sm:$0xff]  ;;  %v209_v36 = vld [vmem:[#allocation10 + $0x30] sm:$0xff]  ;;  %v210_v37 = vld [vmem:[#allocation10 + $0x38] sm:$0xff] }
  0x27   :  { %v207_v38 = vld [vmem:[#allocation10 + $0x20] sm:$0xff]  ;;  %v208_v39 = vld [vmem:[#allocation10 + $0x28] sm:$0xff]  ;;  %v205_v40 = vld [vmem:[#allocation10 + $0x10] sm:$0xff] }
  0x28   :  { %289 = vmatpush.msra.mxu3 %v223_v17  ;;  %329 = vmatpush.msra.mxu2 %v224_v18  ;;  %v206_v41 = vld [vmem:[#allocation10 + $0x18] sm:$0xff]  ;;  %v203_v42 = vld [vmem:[#allocation10] sm:$0xff]  ;;  %v204_v43 = vld [vmem:[#allocation10 + $0x8] sm:$0xff] }
  0x29   :  { %v237_v44 = vld [vmem:[#allocation10 + $0x110] sm:$0xff]  ;;  %v238_v45 = vld [vmem:[#allocation10 + $0x118] sm:$0xff]  ;;  %v235_v46 = vld [vmem:[#allocation10 + $0x100] sm:$0xff] }
  0x2a   :  { %290 = vmatpush.msra.mxu3 %v221_v20  ;;  %330 = vmatpush.msra.mxu2 %v222_v21  ;;  %v236_v47 = vld [vmem:[#allocation10 + $0x108] sm:$0xff] }
  0x2b   :  { %358 = vmatpush.msrb.mxu0 %v238_v45  ;;  %v151_v48 = vld [vmem:[%s683_s4] sm:$0x3]  ;;  %s599_s4 = smov [#allocation13]  }
  0x2c   :  { %291 = vmatpush.msra.mxu3 %v219_v22  ;;  %331 = vmatpush.msra.mxu2 %v220_v23  ;;  %v153_v49 = vperm.slane %v151_v48, 0  ;;  %v154_v53 = vperm.slane %v151_v48, 1  ;;  %v364_v59 = vld [vmem:[%s686_s7] sm:$0x3]  ;;  %s381_s13 = sshll.u32 %s599_s4, 4  ;;  %s382_s13 = int_to_ptr.vmem [resolvable:$true] %s381_s13 }
  0x2d   :  { %400 = vmatmul.msk.f32.vlgmr.msra.gmra.mxu0 %vm122_vm0, %v116_v1  ;;  %v366_v0 = vperm.slane %v364_v59, 0  ;;  %v367_v1 = vperm.slane %v364_v59, 1 }
  0x2e   :  { %292 = vmatpush.msra.mxu3 %v217_v24  ;;  %332 = vmatpush.msra.mxu2 %v218_v25 }
  0x2f   :  { %359 = vmatpush.msrb.mxu0 %v236_v47 }
  0x30   :  { %293 = vmatpush.msra.mxu3 %v215_v27  ;;  %333 = vmatpush.msra.mxu2 %v216_v28 }
  0x32   :  { %294 = vmatpush.msra.mxu3 %v213_v29  ;;  %334 = vmatpush.msra.mxu2 %v214_v30 }
  0x34   :  { %295 = vmatpush.msra.mxu3 %v211_v33  ;;  %335 = vmatpush.msra.mxu2 %v212_v34 }
  0x36   :  { %296 = vmatpush.msra.mxu3 %v209_v36  ;;  %336 = vmatpush.msra.mxu2 %v210_v37 }
  0x38   :  { %297 = vmatpush.msra.mxu3 %v207_v38  ;;  %337 = vmatpush.msra.mxu2 %v208_v39 }
  0x3a   :  { %298 = vmatpush.msra.mxu3 %v205_v40  ;;  %338 = vmatpush.msra.mxu2 %v206_v41 }
  0x3c   :  { %299 = vmatpush.msra.mxu3 %v203_v42  ;;  %339 = vmatpush.msra.mxu2 %v204_v43 }
  0x9a   :  { %v143_v31 = vpop.f32.mrf.mxu0 }
  0x9b   :  { %v144_v32 = vadd.f32 %v412_v26, %v143_v31 }
  0x9d   :  { %v146_v35 = vmax.f32 %v144_v32, 0.0 }
  0x9f   :  { %397 = vmatmul.msk.f32.vlgmr.msra.gmra.mxu1 %vm157_vm1, %v146_v35 }
  0xa0   :  { %318 = vmatpush.msra.mxu1 %v237_v44 }
  0xa2   :  { %319 = vmatpush.msra.mxu1 %v235_v46  ;;  %v258_v57 = vpop.f32.mrf.mxu0 }
  0xa7   :  { %398 = vmatmul.msk.f32.vlgmr.msrb.gmra.mxu1 %vm157_vm1, %v146_v35 }
  0xaa   :  { %v278_v58 = vpop.f32.mrf.mxu0 }
 0x11c   :  { %v178_v50 = vpop.f32.mrf.mxu1 }
 0x11d   :  { %v179_v51 = vadd.f32 %v178_v50, %v153_v49 }
 0x11f   :  { %v201_v52 = vmax.f32 %v179_v51, 0.0 }
 0x121   :  { %300 = vmatmul.f32.vlgmr.msra.gmra.mxu3 %v201_v52  ;;  %340 = vmatmul.f32.vlgmr.msra.gmra.mxu2 %v201_v52 }
 0x124   :  { %v198_v54 = vpop.f32.mrf.mxu1 }
 0x125   :  { %v199_v55 = vadd.f32 %v198_v54, %v154_v53 }
 0x127   :  { %v202_v56 = vmax.f32 %v199_v55, 0.0 }
 0x129   :  { %401 = vmatmul.msk.f32.vlgmr.msra.gmra.mxu1 %vm157_vm1, %v202_v56  ;;  %402 = vmatmul.msk.f32.vlgmr.msrb.gmra.mxu0 %vm157_vm1, %v202_v56 }
 0x1a4   :  { %v301_v60 = vpop.f32.mrf.mxu3  ;;  %v341_v61 = vpop.f32.mrf.mxu2 }
 0x1a5   :  { %v302_v62 = vadd.f32 %v301_v60, %v258_v57  ;;  %v342_v63 = vadd.f32 %v341_v61, %v278_v58 }
 0x1a6   :  { %v321_v2 = vpop.f32.mrf.mxu1  ;;  %v361_v3 = vpop.f32.mrf.mxu0 }
 0x1a7   :  { %v322_v4 = vadd.f32 %v321_v2, %v302_v62  ;;  %v362_v5 = vadd.f32 %v361_v3, %v342_v63 }
 0x1a9   :  { %v370_v6 = vadd.f32 %v366_v0, %v322_v4  ;;  %v371_v7 = vadd.f32 %v367_v1, %v362_v5 }
 0x1ab   :  { %v372_v8 = vmax.f32 %v370_v6, 0.0  ;;  %v373_v9 = vmax.f32 %v371_v7, 0.0 }
 0x1ad   :  { %374 = vst [vmem:[#allocation13] sm:$0xff] %v372_v8 }
 0x1ae   :  { %375 = vst [vmem:[#allocation13 + $0x8] sm:$0xff] %v373_v9 }
 0x1af   :  { %386 = dma.vmem_to_hbm [thread:$0]  %s382_s13, 256, %s384_s16, [#allocation4]  }
 0x1b0   :  { %589 = dma.done.wait [#allocation4], 256  }
 0x1b1   :  { %590 = vsyncadd [#allocation4], 4294967040 }
 0x1b2   :  { %391 = vsyncpa [#allocation3], 1 }
 0x1b3   :  { %392 = vsyncpa [#allocation6], 1 }
 0x1b4   :  { %393 = vsyncpa [#allocation9], 1 }
 0x1b5   :  { %394 = vsyncpa [#allocation12], 1 }
 0x1b6   :  { %395 = vsyncpa [#allocation4], 1 }

</bundles_post_ra>
